<compile_context>
chip_gen: v7x
topology: tpu7x:2x2x1
jax: 0.10.0
libtpu: 0.0.40
codegen_flags: <defaults>
</compile_context>

<pallas_src>
import jax
import jax.numpy as jnp
from jax.experimental import pallas as pl
from jax.experimental.pallas import tpu as pltpu


def mlp_kernel(x_ref, w1_ref, b1_ref, w2_ref, b2_ref, w3_ref, b3_ref, o_ref):
    # x_ref: (TB, 9) tile in its native HBM layout; cast to the MXU dtype here
    # (no-op for f32, bf16 halves vreg pressure when weights are bf16).
    x = x_ref[...].astype(w1_ref.dtype)

    # fc1: contract the feature axis of both operands -> (64, TB), f32 acc.
    h1 = jax.lax.dot_general(
        w1_ref[...], x,
        dimension_numbers=(((1,), (1,)), ((), ())),
        preferred_element_type=jnp.float32)
    h1 = jnp.maximum(h1 + b1_ref[...], 0.0)              # bias (64,1), f32 VPU

    # fc2: (32, 64) @ (64, TB) -> (32, TB), f32 acc.
    h2 = jnp.dot(w2_ref[...], h1.astype(w2_ref.dtype),
                 preferred_element_type=jnp.float32)
    h2 = jnp.maximum(h2 + b2_ref[...], 0.0)              # bias (32,1), f32 VPU

    # fc3 (N=1): VPU multiply + sublane reduce; result is lane-dense (1, TB).
    h3 = jnp.sum(h2 * w3_ref[...], axis=0, keepdims=True) + b3_ref[...]

    o_ref[...] = jax.nn.sigmoid(h3).astype(o_ref.dtype)


def _round_up(n, m):
    return ((n + m - 1) // m) * m


def _choose_tb(B, tb_max):
    """128-multiple batch tile; >= 2 grid steps when possible (v7x megacore)."""
    tb_max = max(128, (tb_max // 128) * 128)
    if B <= 128:
        return 128
    return min(tb_max, _round_up((B + 1) // 2, 128))


def net_forward(x, w1, b1, w2, b2, w3, b3, *, tb_max=4096,
                compute_dtype=jnp.bfloat16):
    """Forward pass of `Net`.

    x : (B, 9)
    Weights in PyTorch nn.Linear layout:
      w1 (64, 9), b1 (64,), w2 (32, 64), b2 (32,), w3 (1, 32), b3 (1,)
    Returns (B, 1) float32, matching `Net.forward`.
    """
    B, F = x.shape
    H1 = w1.shape[0]
    H2 = w2.shape[0]

    TB = _choose_tb(B, tb_max)
    grid = (pl.cdiv(B, TB),)      # partial tail tile handled by Pallas masking

    # Parameter layout plumbing (tiny, one-time).
    w1c = w1.astype(compute_dtype)                   # (64, 9)   MXU dtype
    w2c = w2.astype(compute_dtype)                   # (32, 64)  MXU dtype
    w3c = w3.T.astype(jnp.float32)                   # (32, 1)   VPU, keep f32
    b1c = b1.astype(jnp.float32).reshape(H1, 1)      # (64, 1)
    b2c = b2.astype(jnp.float32).reshape(H2, 1)      # (32, 1)
    b3c = b3.astype(jnp.float32).reshape(1, 1)       # (1, 1)

    # Constant block index -> parameters stay VMEM-resident across batch tiles.
    const = lambda a: pl.BlockSpec(a.shape, lambda i: (0, 0))

    outT = pl.pallas_call(
        mlp_kernel,
        out_shape=jax.ShapeDtypeStruct((1, B), jnp.float32),
        grid=grid,
        in_specs=[
            # x tile in native (B, 9) layout (contiguous DMA, no HBM transpose).
            # pipeline_mode=pl.Buffered(3) could deepen this pipeline, but with
            # TB >= 512 the default double-buffering already hides the DMA.
            pl.BlockSpec((TB, F), lambda i: (i, 0)),
            const(w1c), const(b1c),
            const(w2c), const(b2c),
            const(w3c), const(b3c),
        ],
        out_specs=pl.BlockSpec((1, TB), lambda i: (0, i)),   # lane-dense tile
        compiler_params=pltpu.CompilerParams(
            dimension_semantics=("parallel",),   # shard tiles across TCs (v7x)
        ),
    )(x, w1c, b1c, w2c, b2c, w3c, b3c)

    # (1, B) -> (B, 1) is a free row-major reshape (no transpose / data motion).
    return outT.reshape(B, 1)


def init_params(key):
    # Deterministic init, PyTorch nn.Linear weight layout (out_feat, in_feat).
    k1, k2, k3, k4, k5, k6 = jax.random.split(key, 6)
    w1 = jax.random.normal(k1, (64, 9), jnp.float32) * 0.33
    b1 = jax.random.normal(k2, (64,), jnp.float32) * 0.1
    w2 = jax.random.normal(k3, (32, 64), jnp.float32) * 0.125
    b2 = jax.random.normal(k4, (32,), jnp.float32) * 0.1
    w3 = jax.random.normal(k5, (1, 32), jnp.float32) * 0.176
    b3 = jax.random.normal(k6, (1,), jnp.float32) * 0.1
    return w1, b1, w2, b2, w3, b3


if __name__ == "__main__":
    key = jax.random.PRNGKey(0)
    kx, kp = jax.random.split(key)
    w1, b1, w2, b2, w3, b3 = init_params(kp)

    def reference(x):
        # Pure-JAX reference (PyTorch semantics: y = x @ W.T + b).
        h = jnp.maximum(x @ w1.T + b1, 0.0)
        h = jnp.maximum(h @ w2.T + b2, 0.0)
        return jax.nn.sigmoid(h @ w3.T + b3)

    # B=1000 -> TB=512, grid=2: exercises the two-tile grid (both TCs on v7x)
    # and the masked partial tail tile (488 of 512 lanes valid).
    B = 1000
    x = jax.random.normal(kx, (B, 9), jnp.float32)
    ref = reference(x)

    out_f32 = jax.block_until_ready(
        net_forward(x, w1, b1, w2, b2, w3, b3, compute_dtype=jnp.float32))
    assert out_f32.shape == (B, 1)
    assert jnp.allclose(out_f32, ref, atol=1e-5), "f32 mismatch vs reference"

    # Default bf16 MXU path (f32 accumulation + f32 bias/activation math).
    out_bf16 = jax.block_until_ready(net_forward(x, w1, b1, w2, b2, w3, b3))
    assert out_bf16.shape == (B, 1)
    assert jnp.allclose(out_bf16, ref, atol=5e-2), "bf16 mismatch vs reference"

    # Tiny-tail case: B=257 -> TB=256, grid=2, last tile has 1 valid lane.
    B2 = 257
    x2 = jax.random.normal(kx, (B2, 9), jnp.float32)
    ref2 = reference(x2)
    out2 = jax.block_until_ready(
        net_forward(x2, w1, b1, w2, b2, w3, b3, compute_dtype=jnp.float32))
    assert out2.shape == (B2, 1)
    assert jnp.allclose(out2, ref2, atol=1e-5), "tail-tile mismatch vs reference"

    print("KERNEL_OK")
</pallas_src>

<mosaic_0001>
module attributes {stable_mosaic.version = 11 : i64} {
  func.func @mlp_kernel(%arg0: i32, %arg1: memref<512x9xf32, #tpu.memory_space<vmem>>, %arg2: memref<64x9xf32, #tpu.memory_space<vmem>>, %arg3: memref<64x1xf32, #tpu.memory_space<vmem>>, %arg4: memref<32x64xf32, #tpu.memory_space<vmem>>, %arg5: memref<32x1xf32, #tpu.memory_space<vmem>>, %arg6: memref<32x1xf32, #tpu.memory_space<vmem>>, %arg7: memref<1x1xf32, #tpu.memory_space<vmem>>, %arg8: memref<1x512xf32, #tpu.memory_space<vmem>>) attributes {dimension_semantics = [#tpu.dimension_semantics<parallel>], iteration_bounds = array<i64: 2>, scalar_prefetch = 0 : i64, scratch_operands = 0 : i64, tpu.core_type = #tpu.core_type<tc>, window_params = [{transform_indices = @transform_0, window_bounds = array<i64: 512, 9>}, {pipeline_mode = #tpu.pipeline_mode<synchronous>, transform_indices = @transform_1, window_bounds = array<i64: 64, 9>}, {pipeline_mode = #tpu.pipeline_mode<synchronous>, transform_indices = @transform_2, window_bounds = array<i64: 64, 1>}, {pipeline_mode = #tpu.pipeline_mode<synchronous>, transform_indices = @transform_3, window_bounds = array<i64: 32, 64>}, {pipeline_mode = #tpu.pipeline_mode<synchronous>, transform_indices = @transform_4, window_bounds = array<i64: 32, 1>}, {pipeline_mode = #tpu.pipeline_mode<synchronous>, transform_indices = @transform_5, window_bounds = array<i64: 32, 1>}, {pipeline_mode = #tpu.pipeline_mode<synchronous>, transform_indices = @transform_6, window_bounds = array<i64: 1, 1>}, {transform_indices = @transform_7, window_bounds = array<i64: 1, 512>}]} {
    %c0 = arith.constant 0 : index
    %c0_0 = arith.constant 0 : index
    %0 = vector.load %arg1[%c0, %c0_0] : memref<512x9xf32, #tpu.memory_space<vmem>>, vector<512x9xf32>
    %c0_1 = arith.constant 0 : index
    %c0_2 = arith.constant 0 : index
    %1 = vector.load %arg2[%c0_1, %c0_2] : memref<64x9xf32, #tpu.memory_space<vmem>>, vector<64x9xf32>
    %cst = arith.constant dense<0.000000e+00> : vector<64x512xf32>
    %2 = tpu.matmul %1, %0, %cst {dimension_numbers = #tpu.dot_dimension_numbers<[1], [1], [0], [0], [0, 0, 1, 0], [], []>} : vector<64x9xf32>, vector<512x9xf32>, vector<64x512xf32> -> vector<64x512xf32>
    %c0_3 = arith.constant 0 : index
    %c0_4 = arith.constant 0 : index
    %3 = vector.load %arg3[%c0_3, %c0_4] : memref<64x1xf32, #tpu.memory_space<vmem>>, vector<64x1xf32>
    %4 = vector.broadcast %3 : vector<64x1xf32> to vector<64x512xf32>
    %5 = arith.addf %2, %4 : vector<64x512xf32>
    %cst_5 = arith.constant 0.000000e+00 : f32
    %6 = vector.broadcast %cst_5 : f32 to vector<64x512xf32>
    %7 = arith.maximumf %5, %6 : vector<64x512xf32>
    %c0_6 = arith.constant 0 : index
    %c0_7 = arith.constant 0 : index
    %8 = vector.load %arg4[%c0_6, %c0_7] : memref<32x64xf32, #tpu.memory_space<vmem>>, vector<32x64xf32>
    %cst_8 = arith.constant dense<0.000000e+00> : vector<32x512xf32>
    %9 = tpu.matmul %8, %7, %cst_8 {dimension_numbers = #tpu.dot_dimension_numbers<[1], [0], [0], [1], [0, 0, 1, 1], [], []>} : vector<32x64xf32>, vector<64x512xf32>, vector<32x512xf32> -> vector<32x512xf32>
    %c0_9 = arith.constant 0 : index
    %c0_10 = arith.constant 0 : index
    %10 = vector.load %arg5[%c0_9, %c0_10] : memref<32x1xf32, #tpu.memory_space<vmem>>, vector<32x1xf32>
    %11 = vector.broadcast %10 : vector<32x1xf32> to vector<32x512xf32>
    %12 = arith.addf %9, %11 : vector<32x512xf32>
    %cst_11 = arith.constant 0.000000e+00 : f32
    %13 = vector.broadcast %cst_11 : f32 to vector<32x512xf32>
    %14 = arith.maximumf %12, %13 : vector<32x512xf32>
    %c0_12 = arith.constant 0 : index
    %c0_13 = arith.constant 0 : index
    %15 = vector.load %arg6[%c0_12, %c0_13] : memref<32x1xf32, #tpu.memory_space<vmem>>, vector<32x1xf32>
    %16 = vector.broadcast %15 : vector<32x1xf32> to vector<32x512xf32>
    %17 = arith.mulf %14, %16 : vector<32x512xf32>
    %cst_14 = arith.constant dense<0.000000e+00> : vector<512xf32>
    %18 = vector.multi_reduction <add>, %17, %cst_14 [0] : vector<32x512xf32> to vector<512xf32>
    %19 = vector.shape_cast %18 : vector<512xf32> to vector<1x512xf32>
    %c0_15 = arith.constant 0 : index
    %c0_16 = arith.constant 0 : index
    %20 = vector.load %arg7[%c0_15, %c0_16] : memref<1x1xf32, #tpu.memory_space<vmem>>, vector<1x1xf32>
    %21 = vector.broadcast %20 : vector<1x1xf32> to vector<1x512xf32>
    %22 = arith.addf %19, %21 : vector<1x512xf32>
    %23 = arith.negf %22 : vector<1x512xf32>
    %24 = math.exp %23 : vector<1x512xf32>
    %cst_17 = arith.constant 1.000000e+00 : f32
    %25 = vector.broadcast %cst_17 : f32 to vector<1x512xf32>
    %26 = arith.addf %25, %24 : vector<1x512xf32>
    %27 = arith.divf %25, %26 : vector<1x512xf32>
    %c0_18 = arith.constant 0 : index
    %c0_19 = arith.constant 0 : index
    %28 = vector.load %arg8[%c0_18, %c0_19] : memref<1x512xf32, #tpu.memory_space<vmem>>, vector<1x512xf32>
    tpu.vector_store %arg8[%c0_18, %c0_19], %27 {strides = array<i32>} : memref<1x512xf32, #tpu.memory_space<vmem>>, vector<1x512xf32>,
    return
  }
  func.func @transform_0(%arg0: i32) -> (i32, i32) {
    %c0_i32 = arith.constant 0 : i32
    %c0_i32_0 = arith.constant 0 : i32
    return %arg0, %c0_i32 : i32, i32
  }
  func.func @transform_1(%arg0: i32) -> (i32, i32) {
    %c0_i32 = arith.constant 0 : i32
    %c0_i32_0 = arith.constant 0 : i32
    %c0_i32_1 = arith.constant 0 : i32
    return %c0_i32, %c0_i32_0 : i32, i32
  }
  func.func @transform_2(%arg0: i32) -> (i32, i32) {
    %c0_i32 = arith.constant 0 : i32
    %c0_i32_0 = arith.constant 0 : i32
    %c0_i32_1 = arith.constant 0 : i32
    return %c0_i32, %c0_i32_0 : i32, i32
  }
  func.func @transform_3(%arg0: i32) -> (i32, i32) {
    %c0_i32 = arith.constant 0 : i32
    %c0_i32_0 = arith.constant 0 : i32
    %c0_i32_1 = arith.constant 0 : i32
    return %c0_i32, %c0_i32_0 : i32, i32
  }
  func.func @transform_4(%arg0: i32) -> (i32, i32) {
    %c0_i32 = arith.constant 0 : i32
    %c0_i32_0 = arith.constant 0 : i32
    %c0_i32_1 = arith.constant 0 : i32
    return %c0_i32, %c0_i32_0 : i32, i32
  }
  func.func @transform_5(%arg0: i32) -> (i32, i32) {
    %c0_i32 = arith.constant 0 : i32
    %c0_i32_0 = arith.constant 0 : i32
    %c0_i32_1 = arith.constant 0 : i32
    return %c0_i32, %c0_i32_0 : i32, i32
  }
  func.func @transform_6(%arg0: i32) -> (i32, i32) {
    %c0_i32 = arith.constant 0 : i32
    %c0_i32_0 = arith.constant 0 : i32
    %c0_i32_1 = arith.constant 0 : i32
    return %c0_i32, %c0_i32_0 : i32, i32
  }
  func.func @transform_7(%arg0: i32) -> (i32, i32) {
    %c0_i32 = arith.constant 0 : i32
    %c0_i32_0 = arith.constant 0 : i32
    return %c0_i32, %arg0 : i32, i32
  }
}

</mosaic_0001>

<bundles_post_ra>
// kernel: tpu_custom_call.1
= control target key start
LH: loop header
LB: loop body
LE: loop exit
PB: predicated region body
PF: predicated region fallthrough
CT: control target
= control target key end

     0   :  { %s2229_s0 = inlined_call_operand.vmem [shape: f32[1000,9], index: 0, kind: input, shape index: {}]   ;;  %s2230_s1 = inlined_call_operand.vmem [shape: f32[64,9], index: 1, kind: input, shape index: {}]   ;;  %s2231_s2 = inlined_call_operand.vmem [shape: f32[64,1], index: 2, kind: input, shape index: {}]   ;;  %s2232_s3 = inlined_call_operand.vmem [shape: f32[32,64], index: 3, kind: input, shape index: {}]   ;;  %s2233_s4 = inlined_call_operand.vmem [shape: f32[32,1], index: 4, kind: input, shape index: {}]   ;;  %s2234_s5 = inlined_call_operand.vmem [shape: f32[32,1], index: 5, kind: input, shape index: {}]   ;;  %s2235_s6 = inlined_call_operand.<no memory space> [shape: f32[1,1], index: 6, kind: input, shape index: {}]   ;;  %s2236_s7 = inlined_call_operand.hbm [shape: f32[1,1000], index: 7, kind: output, shape index: {}]  }
   0x1   :  { %v12_v0 = vstv %s2235_s6 }
   0x2   :  { %13 = vst [vmem:[#allocation2] sm:$0x1] %v12_v0 }
   0x3   :  { %14 = vsyncpa [#allocation4], 0 }
   0x4   :  { %16 = vsyncpa [#allocation4 + $0x1], 0  ;;  %s1854_s26 = smov 0   ;;  %s1856_s27 = smov 0  }
   0x5   :  { %s1858_s28 = smov 0   ;;  %s1860_s29 = smov 0  }
   0x6 LB: > { %s1353_s6 = sadd.s32 4294967295, %s1805_s29   ;;  %s1354_s30 = sadd.s32 4294967294, %s1805_s29   ;;  %s1805_s29 = sphi %s1860_s29, %s2244_s29   ;;  %s1801_s28 = sphi %s1858_s28, %s2243_s28   ;;  %s1797_s27 = sphi %s1856_s27, %s2242_s27   ;;  %s1793_s26 = sphi %s1854_s26, %s2241_s26  }
   0x7   : > { %s1877_s8 = sadd.s32 1, %s1805_s29   ;;  %s181_s9 = sadd.s32 1, %s1801_s28 }
   0x8   : > { %s178_s10 = ssub.s32 %s1805_s29, %s1877_s8  ;;  %p191_p0 = scmp.ne.s32.totalorder %s1801_s28, %s1797_s27 }
   0x9   : > { %p179_p1 = scmp.eq.s32.totalorder %s178_s10, 0  ;;  %p192_p2 = scmp.eq.s32.totalorder %s1353_s6, 1 }
   0xa   : > { %p197_p3 = scmp.ne.s32.totalorder %s1797_s27, %s1793_s26  ;;  %p198_p4 = scmp.eq.s32.totalorder %s1354_s30, 1 }
   0xb   : > { %s1887_s11 = scalar_select %p179_p1, %s1801_s28, %s181_s9  }
   0xc   : > { %p1889_p5 = por %p192_p2, %p191_p0  ;;  %p1893_p6 = por %p198_p4, %p197_p3 }
   0xd   : > { %p1357_p7 = scmp.ge.s32.totalorder %s1805_s29, 1  ;;  %p251_p8 = scmp.lt.s32.totalorder %s1805_s29, 3 }
   0xf   : > { %p252_p9 = pnand %p1357_p7, %p251_p8 }
  0x10   : > { %s1899_s14 = sshll.u32 (!%p252_p9), %s1353_s6, 6  ;;  %vm422_vm0 = vcmask (!%p252_p9), 72704   ;;  %v1904_v1 = vld [vmem:[%s2230_s1] sm:$0xff] (!%p252_p9)  ;;  %v1807_v2 = vmov (!%p252_p9), 0   ;;  %v376_v4 = vld [vmem:[%s2231_s2 + $0x10] sm:$0xff] (!%p252_p9)  ;;  %v375_v5 = vld [vmem:[%s2231_s2 + $0x8] sm:$0xff] (!%p252_p9) }
  0x11   : > { %255 = sbr.rel (%p252_p9) target bundleno = 644 (0x284), region = 48  ;;  %p292_p10 = scmp.lt.s32.totalorder (!%p252_p9), %s1899_s14, 124  ;;  %1491 = vmatprep.mubr.msk.f32.mxu0 (!%p252_p9), %vm422_vm0, %v1904_v1  ;;  %1539 = vmatprep.mubr.msk.f32.mxu1 (!%p252_p9), %vm422_vm0, %v1904_v1  ;;  %v374_v3 = vld [vmem:[%s2231_s2] sm:$0xff] (!%p252_p9)  ;;  %vm1928_vm1 = vmpackc.low (!%p252_p9), %vm422_vm0, %vm422_vm0  ;;  %v377_v7 = vld [vmem:[%s2231_s2 + $0x18] sm:$0xff] (!%p252_p9)  ;;  %vm925_vm2 = vcmask (!%p252_p9), 523264  }
  0x12   : > { %1725 = vset.pattern.permute.xlu0 (!%p252_p9), %v1807_v2  ;;  %1726 = vset.pattern.permute.xlu1 (!%p252_p9), %v1807_v2  ;;  %v378_v11 = vld [vmem:[%s2231_s2 + $0x20] sm:$0xff] (!%p252_p9)  ;;  %v380_v27 = vld [vmem:[%s2231_s2 + $0x30] sm:$0xff] (!%p252_p9)  ;;  %v379_v28 = vld [vmem:[%s2231_s2 + $0x28] sm:$0xff] (!%p252_p9)  ;;  %s2187_s23 = scalar_lea.hbm (!%p252_p9), %s2236_s7, %s1899_s14  ;;  %s1810_s6 = smov (!%p252_p9), [#allocation3]  }
  0x13   : > { %384 = vperm.xlu0 (!%p252_p9), %1725, %v374_v3   ;;  %394 = vperm.xlu1 (!%p252_p9), %1726, %v376_v4   ;;  %v381_v38 = vld [vmem:[%s2231_s2 + $0x38] sm:$0xff] (!%p252_p9)  ;;  %v901_v42 = vld [vmem:[%s2233_s4] sm:$0xff] (!%p252_p9)  ;;  %v902_v43 = vld [vmem:[%s2233_s4 + $0x8] sm:$0xff] (!%p252_p9) }
  0x14   : > { %v903_v52 = vld [vmem:[%s2233_s4 + $0x10] sm:$0xff] (!%p252_p9)  ;;  %v1132_v57 = vld [vmem:[%s2234_s5] sm:$0xff] (!%p252_p9)  ;;  %v904_v61 = vld [vmem:[%s2233_s4 + $0x18] sm:$0xff] (!%p252_p9) }
  0x15   : > { %v1134_v4 = vld [vmem:[%s2234_s5 + $0x10] sm:$0xff] (!%p252_p9)  ;;  %v370_v6 = vld [vmem:[%s2230_s1 + $0x20] sm:$0xff] (!%p252_p9) }
  0x17   : > { %389 = vperm.xlu0 (!%p252_p9), %1725, %v375_v5   ;;  %399 = vperm.xlu1 (!%p252_p9), %1726, %v377_v7   ;;  %v1133_v7 = vld [vmem:[%s2234_s5 + $0x8] sm:$0xff] (!%p252_p9) }
  0x18   : > { %s293_s17 = scalar_select %p292_p10, %s1899_s14, 124 }
  0x1a   : > { %s1360_s22 = sshll.u32 %s293_s17, 3  ;;  %s284_s17 = sand.u32 1, %s1797_s27  }
  0x1b   : > { %s1924_s30 = scalar_lea.vmem %s2229_s0, %s1360_s22  ;;  %404 = vperm.xlu0 %1725, %v378_v11   ;;  %409 = vperm.xlu1 %1726, %v379_v28   ;;  %v1208_v11 = vld [vmem:[#allocation2] sm:$0x1]  ;;  %s1358_s18 = sshll.u32 %s284_s17, 2 }
  0x1c   : > { %v318_v8 = vld [vmem:[%s1924_s30 + $0x80] sm:$0xff]  ;;  %v319_v9 = vld [vmem:[%s1924_s30 + $0x88] sm:$0xff]  ;;  %v320_v20 = vld [vmem:[%s1924_s30 + $0x90] sm:$0xff]  ;;  %s286_s19 = scalar_lea.vmem [#allocation3], %s1358_s18  ;;  %s1281_s24 = scalar_lea.sflag [#allocation4], %s284_s17 }
  0x1d   : > { %v350_v10 = vld [vmem:[%s1924_s30 + $0x180] sm:$0xff]  ;;  %v1555_v12 = vpack.c.bf16 %v319_v9, %v318_v8  ;;  %v351_v13 = vld [vmem:[%s1924_s30 + $0x188] sm:$0xff]  ;;  %v321_v22 = vld [vmem:[%s1924_s30 + $0x98] sm:$0xff]  ;;  %s1295_s20 = sshll.u32 %s286_s19, 4  ;;  %s2189_s20 = int_to_ptr.vmem [resolvable:$true] %s1295_s20 }
  0x1e   : > { %v302_v14 = vld [vmem:[%s1924_s30] sm:$0xff]  ;;  %v303_v15 = vld [vmem:[%s1924_s30 + $0x8] sm:$0xff]  ;;  %v1603_v16 = vpack.c.bf16 %v351_v13, %v350_v10  ;;  %v352_v23 = vld [vmem:[%s1924_s30 + $0x190] sm:$0xff]  ;;  %v1561_v25 = vpack.c.bf16 %v321_v22, %v320_v20  ;;  %s1743_s25 = scalar_lea.vmem %s2189_s20, 64 }
  0x1f   : > { %v1558_v17 = vpack.c.bf16 %v303_v15, %v302_v14  ;;  %v334_v18 = vld [vmem:[%s1924_s30 + $0x100] sm:$0xff]  ;;  %v335_v19 = vld [vmem:[%s1924_s30 + $0x108] sm:$0xff]  ;;  %1557 = vmatprep.subr.msk.bf16.mxu0 %vm1928_vm1, %v1555_v12  ;;  %v353_v24 = vld [vmem:[%s1924_s30 + $0x198] sm:$0xff]  ;;  %414 = vperm.xlu0 %1725, %v380_v27   ;;  %p1744_p11 = scmp.ne.s32.totalorder %s2189_s20, %s1743_s25 }
  0x20   : > { %v1606_v21 = vpack.c.bf16 %v335_v19, %v334_v18  ;;  %1605 = vmatprep.subr.msk.bf16.mxu1 %vm1928_vm1, %v1603_v16  ;;  %v1609_v26 = vpack.c.bf16 %v353_v24, %v352_v23  ;;  %v304_v29 = vld [vmem:[%s1924_s30 + $0x10] sm:$0xff]  ;;  %v305_v30 = vld [vmem:[%s1924_s30 + $0x18] sm:$0xff]  ;;  %v322_v33 = vld [vmem:[%s1924_s30 + $0xa0] sm:$0xff]  ;;  %419 = vperm.xlu1 %1726, %v381_v38  }
  0x21   : > { %1560 = vmatpush3.bf16.xpose.msk.msra.mxu0 %vm1928_vm1, %v1558_v17  ;;  %v336_v31 = vld [vmem:[%s1924_s30 + $0x110] sm:$0xff]  ;;  %v337_v32 = vld [vmem:[%s1924_s30 + $0x118] sm:$0xff]  ;;  %v323_v34 = vld [vmem:[%s1924_s30 + $0xa8] sm:$0xff]  ;;  %v1564_v37 = vpack.c.bf16 %v305_v30, %v304_v29  ;;  %p1745_p12 = pnand %p1744_p11, %p1889_p5 }
  0x22   : > { %1608 = vmatpush3.bf16.xpose.msk.msra.mxu1 %vm1928_vm1, %v1606_v21  ;;  %1563 = vmatprep.subr.msk.bf16.mxu0 %vm1928_vm1, %v1561_v25  ;;  %v354_v35 = vld [vmem:[%s1924_s30 + $0x1a0] sm:$0xff]  ;;  %v355_v36 = vld [vmem:[%s1924_s30 + $0x1a8] sm:$0xff]  ;;  %v1612_v39 = vpack.c.bf16 %v337_v32, %v336_v31  ;;  %v1567_v40 = vpack.c.bf16 %v323_v34, %v322_v33  ;;  %v324_v48 = vld [vmem:[%s1924_s30 + $0xb0] sm:$0xff] }
  0x23   : > { %1611 = vmatprep.subr.msk.bf16.mxu1 %vm1928_vm1, %v1609_v26  ;;  %v1615_v41 = vpack.c.bf16 %v355_v36, %v354_v35  ;;  %v306_v44 = vld [vmem:[%s1924_s30 + $0x20] sm:$0xff]  ;;  %v307_v45 = vld [vmem:[%s1924_s30 + $0x28] sm:$0xff]  ;;  %v325_v49 = vld [vmem:[%s1924_s30 + $0xb8] sm:$0xff]  ;;  %907 = vperm.xlu0 %1725, %v901_v42   ;;  %p1746_p13 = pneg %p1745_p12 }
  0x24   : > { %v338_v46 = vld [vmem:[%s1924_s30 + $0x120] sm:$0xff]  ;;  %v339_v47 = vld [vmem:[%s1924_s30 + $0x128] sm:$0xff]  ;;  %v356_v50 = vld [vmem:[%s1924_s30 + $0x1b0] sm:$0xff]  ;;  %912 = vperm.xlu1 %1726, %v902_v43   ;;  %v1570_v53 = vpack.c.bf16 %v307_v45, %v306_v44  ;;  %v1573_v55 = vpack.c.bf16 %v325_v49, %v324_v48 }
  0x25   : > { %v357_v51 = vld [vmem:[%s1924_s30 + $0x1b8] sm:$0xff]  ;;  %v1618_v54 = vpack.c.bf16 %v339_v47, %v338_v46  ;;  %v308_v58 = vld [vmem:[%s1924_s30 + $0x30] sm:$0xff]  ;;  %v326_v63 = vld [vmem:[%s1924_s30 + $0xc0] sm:$0xff] }
  0x26   : > { %v1621_v56 = vpack.c.bf16 %v357_v51, %v356_v50  ;;  %v309_v59 = vld [vmem:[%s1924_s30 + $0x38] sm:$0xff]  ;;  %v340_v60 = vld [vmem:[%s1924_s30 + $0x130] sm:$0xff]  ;;  %v327_v0 = vld [vmem:[%s1924_s30 + $0xc8] sm:$0xff] }
  0x27   : > { %917 = vperm.xlu0 %1725, %v903_v52   ;;  %v341_v62 = vld [vmem:[%s1924_s30 + $0x138] sm:$0xff]  ;;  %v358_v2 = vld [vmem:[%s1924_s30 + $0x1c0] sm:$0xff]  ;;  %v359_v3 = vld [vmem:[%s1924_s30 + $0x1c8] sm:$0xff]  ;;  %v1576_v5 = vpack.c.bf16 %v309_v59, %v308_v58  ;;  %v1579_v9 = vpack.c.bf16 %v327_v0, %v326_v63 }
  0x28   : > { %922 = vperm.xlu1 %1726, %v904_v61   ;;  %v1624_v8 = vpack.c.bf16 %v341_v62, %v340_v60  ;;  %v1627_v10 = vpack.c.bf16 %v359_v3, %v358_v2  ;;  %v1135_v12 = vld [vmem:[%s2234_s5 + $0x18] sm:$0xff]  ;;  %v310_v13 = vld [vmem:[%s1924_s30 + $0x40] sm:$0xff]  ;;  %v311_v14 = vld [vmem:[%s1924_s30 + $0x48] sm:$0xff]  ;;  %v1808_v60 = vmov 0.0  }
  0x29   : > { %1566 = vmatpush3.bf16.xpose.msk.msra.mxu0 %vm1928_vm1, %v1564_v37  ;;  %v342_v15 = vld [vmem:[%s1924_s30 + $0x140] sm:$0xff]  ;;  %v343_v16 = vld [vmem:[%s1924_s30 + $0x148] sm:$0xff]  ;;  %v328_v17 = vld [vmem:[%s1924_s30 + $0xd0] sm:$0xff]  ;;  %v1582_v21 = vpack.c.bf16 %v311_v14, %v310_v13 }
  0x2a   : > { %1614 = vmatpush3.bf16.xpose.msk.msra.mxu1 %vm1928_vm1, %v1612_v39  ;;  %1569 = vmatprep.subr.msk.bf16.mxu0 %vm1928_vm1, %v1567_v40  ;;  %v329_v18 = vld [vmem:[%s1924_s30 + $0xd8] sm:$0xff]  ;;  %v360_v19 = vld [vmem:[%s1924_s30 + $0x1d0] sm:$0xff]  ;;  %v1630_v22 = vpack.c.bf16 %v343_v16, %v342_v15  ;;  %v330_v29 = vld [vmem:[%s1924_s30 + $0xe0] sm:$0xff] }
  0x2b   : > { %1617 = vmatprep.subr.msk.bf16.mxu1 %vm1928_vm1, %v1615_v41  ;;  %1138 = vperm.xlu0 %1725, %v1132_v57   ;;  %v361_v20 = vld [vmem:[%s1924_s30 + $0x1d8] sm:$0xff]  ;;  %v1585_v23 = vpack.c.bf16 %v329_v18, %v328_v17  ;;  %v312_v25 = vld [vmem:[%s1924_s30 + $0x50] sm:$0xff]  ;;  %v331_v30 = vld [vmem:[%s1924_s30 + $0xe8] sm:$0xff] }
  0x2c   : > { %1143 = vperm.xlu1 %1726, %v1133_v7   ;;  %v1633_v24 = vpack.c.bf16 %v361_v20, %v360_v19  ;;  %v313_v26 = vld [vmem:[%s1924_s30 + $0x58] sm:$0xff]  ;;  %v344_v27 = vld [vmem:[%s1924_s30 + $0x150] sm:$0xff]  ;;  %v362_v31 = vld [vmem:[%s1924_s30 + $0x1e0] sm:$0xff]  ;;  %v1591_v35 = vpack.c.bf16 %v331_v30, %v330_v29 }
  0x2d   : > { %v345_v28 = vld [vmem:[%s1924_s30 + $0x158] sm:$0xff]  ;;  %v363_v32 = vld [vmem:[%s1924_s30 + $0x1e8] sm:$0xff]  ;;  %v1588_v33 = vpack.c.bf16 %v313_v26, %v312_v25  ;;  %v314_v37 = vld [vmem:[%s1924_s30 + $0x60] sm:$0xff] }
  0x2e   : > { %v1636_v34 = vpack.c.bf16 %v345_v28, %v344_v27  ;;  %v1639_v36 = vpack.c.bf16 %v363_v32, %v362_v31  ;;  %v315_v38 = vld [vmem:[%s1924_s30 + $0x68] sm:$0xff]  ;;  %v346_v39 = vld [vmem:[%s1924_s30 + $0x160] sm:$0xff]  ;;  %v332_v41 = vld [vmem:[%s1924_s30 + $0xf0] sm:$0xff] }
  0x2f   : > { %1148 = vperm.xlu0 %1725, %v1134_v4   ;;  %v347_v40 = vld [vmem:[%s1924_s30 + $0x168] sm:$0xff]  ;;  %v333_v42 = vld [vmem:[%s1924_s30 + $0xf8] sm:$0xff]  ;;  %v364_v43 = vld [vmem:[%s1924_s30 + $0x1f0] sm:$0xff]  ;;  %v1594_v45 = vpack.c.bf16 %v315_v38, %v314_v37 }
  0x30   : > { %1153 = vperm.xlu1 %1726, %v1135_v12   ;;  %v365_v44 = vld [vmem:[%s1924_s30 + $0x1f8] sm:$0xff]  ;;  %v1642_v46 = vpack.c.bf16 %v347_v40, %v346_v39  ;;  %v1597_v47 = vpack.c.bf16 %v333_v42, %v332_v41  ;;  %v316_v49 = vld [vmem:[%s1924_s30 + $0x70] sm:$0xff]  ;;  %v371_v57 = vld [vmem:[%s2230_s1 + $0x28] sm:$0xff] }
  0x31   : > { %1572 = vmatpush3.bf16.xpose.msk.msra.mxu0 %vm1928_vm1, %v1570_v53  ;;  %v1645_v48 = vpack.c.bf16 %v365_v44, %v364_v43  ;;  %v317_v50 = vld [vmem:[%s1924_s30 + $0x78] sm:$0xff]  ;;  %v348_v51 = vld [vmem:[%s1924_s30 + $0x170] sm:$0xff] }
  0x32   : > { %1620 = vmatpush3.bf16.xpose.msk.msra.mxu1 %vm1928_vm1, %v1618_v54  ;;  %1575 = vmatprep.subr.msk.bf16.mxu0 %vm1928_vm1, %v1573_v55  ;;  %v349_v52 = vld [vmem:[%s1924_s30 + $0x178] sm:$0xff]  ;;  %v1600_v53 = vpack.c.bf16 %v317_v50, %v316_v49  ;;  %v367_v55 = vld [vmem:[%s2230_s1 + $0x8] sm:$0xff]  ;;  %v372_v58 = vld [vmem:[%s2230_s1 + $0x30] sm:$0xff]  ;;  %s1747_s30 = sshll.u32 %s1810_s6, 4  ;;  %s1748_s30 = int_to_ptr.vmem [resolvable:$false] %s1747_s30 }
  0x33   : > { %1623 = vmatprep.subr.msk.bf16.mxu1 %vm1928_vm1, %v1621_v56  ;;  %1211 = vperm.xlu0 %1725, %v1208_v11   ;;  %v1648_v54 = vpack.c.bf16 %v349_v52, %v348_v51  ;;  %v368_v56 = vld [vmem:[%s2230_s1 + $0x10] sm:$0xff]  ;;  %v373_v59 = vld [vmem:[%s2230_s1 + $0x38] sm:$0xff]  ;;  %s1749_s9 = scalar_lea.vmem %s1748_s30, 128  ;;  %p1750_p0 = scmp.lt.s32.totalorder %s2189_s20, %s1748_s30 }
  0x34   : > { %p1751_p1 = scmp.lt.s32.totalorder %s1749_s9, %s1743_s25 }
  0x36   : > { %p1752_p2 = por %p1751_p1, %p1750_p0 }
  0x38   : > { %p1753_p3 = pnand %p1752_p2, %p1746_p13 }
  0x39   : > { %1578 = vmatpush3.bf16.xpose.msk.msra.mxu0 %vm1928_vm1, %v1576_v5 }
  0x3a   : > { %1626 = vmatpush3.bf16.xpose.msk.msra.mxu1 %vm1928_vm1, %v1624_v8  ;;  %1581 = vmatprep.subr.msk.bf16.mxu0 %vm1928_vm1, %v1579_v9 }
  0x3b   : > { %1629 = vmatprep.subr.msk.bf16.mxu1 %vm1928_vm1, %v1627_v10 }
  0x41   : > { %1584 = vmatpush3.bf16.xpose.msk.msra.mxu0 %vm1928_vm1, %v1582_v21 }
  0x42   : > { %1632 = vmatpush3.bf16.xpose.msk.msra.mxu1 %vm1928_vm1, %v1630_v22  ;;  %1587 = vmatprep.subr.msk.bf16.mxu0 %vm1928_vm1, %v1585_v23 }
  0x43   : > { %1635 = vmatprep.subr.msk.bf16.mxu1 %vm1928_vm1, %v1633_v24 }
  0x49   : > { %1590 = vmatpush3.bf16.xpose.msk.msra.mxu0 %vm1928_vm1, %v1588_v33 }
  0x4a   : > { %1638 = vmatpush3.bf16.xpose.msk.msra.mxu1 %vm1928_vm1, %v1636_v34  ;;  %1593 = vmatprep.subr.msk.bf16.mxu0 %vm1928_vm1, %v1591_v35 }
  0x4b   : > { %1641 = vmatprep.subr.msk.bf16.mxu1 %vm1928_vm1, %v1639_v36 }
  0x51   : > { %1596 = vmatpush3.bf16.xpose.msk.msra.mxu0 %vm1928_vm1, %v1594_v45 }
  0x52   : > { %1644 = vmatpush3.bf16.xpose.msk.msra.mxu1 %vm1928_vm1, %v1642_v46  ;;  %1599 = vmatprep.subr.msk.bf16.mxu0 %vm1928_vm1, %v1597_v47 }
  0x53   : > { %1647 = vmatprep.subr.msk.bf16.mxu1 %vm1928_vm1, %v1645_v48 }
  0x59   : > { %1602 = vmatpush3.bf16.xpose.msk.msra.mxu0 %vm1928_vm1, %v1600_v53 }
  0x5a   : > { %1650 = vmatpush3.bf16.xpose.msk.msra.mxu1 %vm1928_vm1, %v1648_v54 }
  0x60   : > { %1492 = vmatmul.mubr.msk.f32.vlgmr.msra.gmra.mrb[0].mxu0 %vm422_vm0, %v1904_v1 }
  0x61   : > { %1540 = vmatmul.mubr.msk.f32.vlgmr.msra.gmra.mrb[0].mxu1 %vm422_vm0, %v1904_v1  ;;  %1493 = vmatprep.mubr.msk.f32.mxu0 %vm422_vm0, %v367_v55  ;;  %v369_v1 = vld [vmem:[%s2230_s1 + $0x18] sm:$0xff] }
  0x62   : > { %1541 = vmatprep.mubr.msk.f32.mxu1 %vm422_vm0, %v367_v55 }
  0x64   : > { %1494 = vmatmul.mubr.msk.f32.gmra.mrb[2].mxu0 %vm422_vm0, %v367_v55 }
  0x65   : > { %1542 = vmatmul.mubr.msk.f32.gmra.mrb[2].mxu1 %vm422_vm0, %v367_v55  ;;  %1495 = vmatprep.mubr.msk.f32.mxu0 %vm422_vm0, %v368_v56 }
  0x66   : > { %1543 = vmatprep.mubr.msk.f32.mxu1 %vm422_vm0, %v368_v56 }
  0x68   : > { %1496 = vmatmul.mubr.msk.f32.gmra.mrb[4].mxu0 %vm422_vm0, %v368_v56 }
  0x69   : > { %1544 = vmatmul.mubr.msk.f32.gmra.mrb[4].mxu1 %vm422_vm0, %v368_v56  ;;  %1497 = vmatprep.mubr.msk.f32.mxu0 %vm422_vm0, %v369_v1 }
  0x6a   : > { %1545 = vmatprep.mubr.msk.f32.mxu1 %vm422_vm0, %v369_v1 }
  0x6c   : > { %1498 = vmatmul.mubr.msk.f32.gmra.mrb[6].mxu0 %vm422_vm0, %v369_v1 }
  0x6d   : > { %1546 = vmatmul.mubr.msk.f32.gmra.mrb[6].mxu1 %vm422_vm0, %v369_v1  ;;  %1499 = vmatprep.mubr.msk.f32.mxu0 %vm422_vm0, %v370_v6 }
  0x6e   : > { %1547 = vmatprep.mubr.msk.f32.mxu1 %vm422_vm0, %v370_v6 }
  0x70   : > { %1500 = vmatmul.mubr.msk.f32.gmra.mrb[8].mxu0 %vm422_vm0, %v370_v6 }
  0x71   : > { %1548 = vmatmul.mubr.msk.f32.gmra.mrb[8].mxu1 %vm422_vm0, %v370_v6  ;;  %1501 = vmatprep.mubr.msk.f32.mxu0 %vm422_vm0, %v371_v57 }
  0x72   : > { %1549 = vmatprep.mubr.msk.f32.mxu1 %vm422_vm0, %v371_v57 }
  0x74   : > { %1502 = vmatmul.mubr.msk.f32.gmra.mrb[10].mxu0 %vm422_vm0, %v371_v57 }
  0x75   : > { %1550 = vmatmul.mubr.msk.f32.gmra.mrb[10].mxu1 %vm422_vm0, %v371_v57  ;;  %1503 = vmatprep.mubr.msk.f32.mxu0 %vm422_vm0, %v372_v58 }
  0x76   : > { %1551 = vmatprep.mubr.msk.f32.mxu1 %vm422_vm0, %v372_v58 }
  0x78   : > { %1504 = vmatmul.mubr.msk.f32.gmra.mrb[12].mxu0 %vm422_vm0, %v372_v58 }
  0x79   : > { %1552 = vmatmul.mubr.msk.f32.gmra.mrb[12].mxu1 %vm422_vm0, %v372_v58  ;;  %1505 = vmatprep.mubr.msk.f32.mxu0 %vm422_vm0, %v373_v59 }
  0x7a   : > { %1553 = vmatprep.mubr.msk.f32.mxu1 %vm422_vm0, %v373_v59 }
  0x7c   : > { %1506 = vmatmul.mubr.msk.f32.gmra.mrb[14].mxu0 %vm422_vm0, %v373_v59 }
  0x7d   : > { %1554 = vmatmul.mubr.msk.f32.gmra.mrb[14].mxu1 %vm422_vm0, %v373_v59  ;;  %1002 = vmatprep.mubr.f32.mxu0 %v1808_v60 }
  0x7e   : > { %1091 = vmatprep.mubr.f32.mxu1 %v1808_v60 }
  0x92   : > { %v385_v61 = vpop.permute.xlu0 %384  ;;  %v395_v13 = vpop.permute.xlu1 %394 }
  0x96   : > { %v390_v4 = vpop.permute.xlu0 %389  ;;  %v400_v35 = vpop.permute.xlu1 %399 }
  0x9a   : > { %v405_v57 = vpop.permute.xlu0 %404 }
 0x133   : > { %v705_v62 = vpop.f32.mrb[0].mxu0 }
 0x134   : > { %v818_v63 = vpop.f32.mrb[0].mxu1  ;;  %v707_v0 = vpop.f32.mrb[1].mxu0  ;;  %v706_v3 = vadd.f32 %v705_v62, %v385_v61 }
 0x135   : > { %v820_v2 = vpop.f32.mrb[1].mxu1  ;;  %v819_v5 = vadd.f32 %v818_v63, %v385_v61  ;;  %v708_v7 = vadd.f32 %v707_v0, %v385_v61  ;;  %v410_v0 = vpop.permute.xlu1 %409 }
 0x136   : > { %v821_v9 = vadd.f32 %v820_v2, %v385_v61  ;;  %v865_v17 = vmax.f32 %v706_v3, 0.0 }
 0x137   : > { %v711_v8 = vpop.f32.mrb[2].mxu0  ;;  %v867_v20 = vmax.f32 %v819_v5, 0.0  ;;  %v866_v21 = vmax.f32 %v708_v7, 0.0 }
 0x138   : > { %v712_v10 = vadd.f32 %v711_v8, %v390_v4  ;;  %v824_v11 = vpop.f32.mrb[2].mxu1  ;;  %v713_v12 = vpop.f32.mrb[3].mxu0  ;;  %v868_v25 = vmax.f32 %v821_v9, 0.0 }
 0x139   : > { %v825_v14 = vadd.f32 %v824_v11, %v390_v4  ;;  %v714_v15 = vadd.f32 %v713_v12, %v390_v4  ;;  %v826_v16 = vpop.f32.mrb[3].mxu1 }
 0x13a   : > { %v869_v18 = vmax.f32 %v712_v10, 0.0  ;;  %v827_v19 = vadd.f32 %v826_v16, %v390_v4 }
 0x13b   : > { %v871_v22 = vmax.f32 %v825_v14, 0.0  ;;  %v870_v23 = vmax.f32 %v714_v15, 0.0  ;;  %v717_v24 = vpop.f32.mrb[4].mxu0 }
 0x13c   : > { %v1653_v26 = vpack.c.bf16 %v869_v18, %v865_v17  ;;  %v872_v27 = vmax.f32 %v827_v19, 0.0  ;;  %v830_v28 = vpop.f32.mrb[4].mxu1  ;;  %v719_v29 = vpop.f32.mrb[5].mxu0  ;;  %v718_v34 = vadd.f32 %v717_v24, %v395_v13 }
 0x13d   : > { %v1669_v30 = vpack.c.bf16 %v871_v22, %v867_v20  ;;  %v1651_v31 = vpack.c.bf16 %v870_v23, %v866_v21  ;;  %v832_v32 = vpop.f32.mrb[5].mxu1  ;;  %v831_v36 = vadd.f32 %v830_v28, %v395_v13  ;;  %v720_v37 = vadd.f32 %v719_v29, %v395_v13 }
 0x13e   : > { %v1667_v33 = vpack.c.bf16 %v872_v27, %v868_v25  ;;  %v833_v39 = vadd.f32 %v832_v32, %v395_v13  ;;  %v873_v46 = vmax.f32 %v718_v34, 0.0  ;;  %v420_v32 = vpop.permute.xlu1 %419 }
 0x13f   : > { %v723_v38 = vpop.f32.mrb[6].mxu0  ;;  %1652 = vmatprep.subr.bf16.mxu0 %v1651_v31  ;;  %v875_v49 = vmax.f32 %v831_v36, 0.0  ;;  %v874_v50 = vmax.f32 %v720_v37, 0.0 }
 0x140   : > { %v724_v40 = vadd.f32 %v723_v38, %v400_v35  ;;  %v836_v41 = vpop.f32.mrb[6].mxu1  ;;  %1668 = vmatprep.subr.bf16.mxu1 %v1667_v33  ;;  %v725_v42 = vpop.f32.mrb[7].mxu0  ;;  %1654 = vmatpush1.bf16.msra.mxu0 %v1653_v26  ;;  %v876_v54 = vmax.f32 %v833_v39, 0.0 }
 0x141   : > { %v837_v43 = vadd.f32 %v836_v41, %v400_v35  ;;  %v726_v44 = vadd.f32 %v725_v42, %v400_v35  ;;  %v838_v45 = vpop.f32.mrb[7].mxu1  ;;  %1670 = vmatpush1.bf16.msra.mxu1 %v1669_v30  ;;  %v415_v26 = vpop.permute.xlu0 %414 }
 0x142   : > { %v877_v47 = vmax.f32 %v724_v40, 0.0  ;;  %v839_v48 = vadd.f32 %v838_v45, %v400_v35 }
 0x143   : > { %v879_v51 = vmax.f32 %v837_v43, 0.0  ;;  %v878_v52 = vmax.f32 %v726_v44, 0.0  ;;  %v729_v53 = vpop.f32.mrb[8].mxu0 }
 0x144   : > { %v1657_v55 = vpack.c.bf16 %v877_v47, %v873_v46  ;;  %v880_v56 = vmax.f32 %v839_v48, 0.0  ;;  %v842_v1 = vpop.f32.mrb[8].mxu1  ;;  %v731_v6 = vpop.f32.mrb[9].mxu0  ;;  %v730_v63 = vadd.f32 %v729_v53, %v405_v57 }
 0x145   : > { %v1673_v58 = vpack.c.bf16 %v879_v51, %v875_v49  ;;  %v1655_v59 = vpack.c.bf16 %v878_v52, %v874_v50  ;;  %v844_v61 = vpop.f32.mrb[9].mxu1  ;;  %v843_v2 = vadd.f32 %v842_v1, %v405_v57  ;;  %v732_v3 = vadd.f32 %v731_v6, %v405_v57  ;;  %v898_v1 = vld [vmem:[%s2232_s3 + $0x8] sm:$0xff]  ;;  %v899_v6 = vld [vmem:[%s2232_s3 + $0x10] sm:$0xff] }
 0x146   : > { %v1671_v62 = vpack.c.bf16 %v880_v56, %v876_v54  ;;  %v845_v5 = vadd.f32 %v844_v61, %v405_v57  ;;  %v881_v13 = vmax.f32 %v730_v63, 0.0  ;;  %v897_v56 = vld [vmem:[%s2232_s3] sm:$0xff]  ;;  %v900_v57 = vld [vmem:[%s2232_s3 + $0x18] sm:$0xff] }
 0x147   : > { %v735_v4 = vpop.f32.mrb[10].mxu0  ;;  %1656 = vmatprep.subr.bf16.mxu0 %v1655_v59  ;;  %v883_v16 = vmax.f32 %v843_v2, 0.0  ;;  %v882_v17 = vmax.f32 %v732_v3, 0.0  ;;  %v913_v59 = vpop.permute.xlu1 %912 }
 0x148   : > { %v736_v7 = vadd.f32 %v735_v4, %v410_v0  ;;  %v848_v8 = vpop.f32.mrb[10].mxu1  ;;  %1672 = vmatprep.subr.bf16.mxu1 %v1671_v62  ;;  %v737_v9 = vpop.f32.mrb[11].mxu0  ;;  %1658 = vmatpush1.bf16.msra.mxu0 %v1657_v55  ;;  %v884_v21 = vmax.f32 %v845_v5, 0.0 }
 0x149   : > { %v849_v10 = vadd.f32 %v848_v8, %v410_v0  ;;  %v738_v11 = vadd.f32 %v737_v9, %v410_v0  ;;  %v850_v12 = vpop.f32.mrb[11].mxu1  ;;  %1674 = vmatpush1.bf16.msra.mxu1 %v1673_v58  ;;  %v908_v58 = vpop.permute.xlu0 %907 }
 0x14a   : > { %v885_v14 = vmax.f32 %v736_v7, 0.0  ;;  %v851_v15 = vadd.f32 %v850_v12, %v410_v0 }
 0x14b   : > { %v887_v18 = vmax.f32 %v849_v10, 0.0  ;;  %v886_v19 = vmax.f32 %v738_v11, 0.0  ;;  %v741_v20 = vpop.f32.mrb[12].mxu0  ;;  %v923_v3 = vpop.permute.xlu1 %922 }
 0x14c   : > { %v1661_v22 = vpack.c.bf16 %v885_v14, %v881_v13  ;;  %v888_v23 = vmax.f32 %v851_v15, 0.0  ;;  %v854_v24 = vpop.f32.mrb[12].mxu1  ;;  %v743_v25 = vpop.f32.mrb[13].mxu0  ;;  %v742_v31 = vadd.f32 %v741_v20, %v415_v26 }
 0x14d   : > { %v1677_v27 = vpack.c.bf16 %v887_v18, %v883_v16  ;;  %v1659_v28 = vpack.c.bf16 %v886_v19, %v882_v17  ;;  %v856_v29 = vpop.f32.mrb[13].mxu1  ;;  %v855_v33 = vadd.f32 %v854_v24, %v415_v26  ;;  %v744_v34 = vadd.f32 %v743_v25, %v415_v26  ;;  %v918_v61 = vpop.permute.xlu0 %917 }
 0x14e   : > { %v1675_v30 = vpack.c.bf16 %v888_v23, %v884_v21  ;;  %v857_v36 = vadd.f32 %v856_v29, %v415_v26  ;;  %v889_v43 = vmax.f32 %v742_v31, 0.0 }
 0x14f   : > { %v747_v35 = vpop.f32.mrb[14].mxu0  ;;  %1660 = vmatprep.subr.bf16.mxu0 %v1659_v28  ;;  %v891_v46 = vmax.f32 %v855_v33, 0.0  ;;  %v890_v47 = vmax.f32 %v744_v34, 0.0  ;;  %v1144_v23 = vpop.permute.xlu1 %1143 }
 0x150   : > { %v748_v37 = vadd.f32 %v747_v35, %v420_v32  ;;  %v860_v38 = vpop.f32.mrb[14].mxu1  ;;  %1676 = vmatprep.subr.bf16.mxu1 %v1675_v30  ;;  %v749_v39 = vpop.f32.mrb[15].mxu0  ;;  %1662 = vmatpush1.bf16.msra.mxu0 %v1661_v22  ;;  %v892_v50 = vmax.f32 %v857_v36, 0.0 }
 0x151   : > { %v861_v40 = vadd.f32 %v860_v38, %v420_v32  ;;  %v750_v41 = vadd.f32 %v749_v39, %v420_v32  ;;  %v862_v42 = vpop.f32.mrb[15].mxu1  ;;  %1678 = vmatpush1.bf16.msra.mxu1 %v1677_v27  ;;  %v1139_v16 = vpop.permute.xlu0 %1138 }
 0x152   : > { %v893_v44 = vmax.f32 %v748_v37, 0.0  ;;  %v863_v45 = vadd.f32 %v862_v42, %v420_v32 }
 0x153   : > { %v895_v48 = vmax.f32 %v861_v40, 0.0  ;;  %v894_v49 = vmax.f32 %v750_v41, 0.0 }
 0x154   : > { %v1665_v51 = vpack.c.bf16 %v893_v44, %v889_v43  ;;  %v896_v52 = vmax.f32 %v863_v45, 0.0 }
 0x155   : > { %v1681_v53 = vpack.c.bf16 %v895_v48, %v891_v46  ;;  %v1663_v54 = vpack.c.bf16 %v894_v49, %v890_v47  ;;  %v1149_v44 = vpop.permute.xlu0 %1148 }
 0x156   : > { %v1679_v55 = vpack.c.bf16 %v896_v52, %v892_v50 }
 0x157   : > { %1664 = vmatprep.subr.bf16.mxu0 %v1663_v54 }
 0x158   : > { %1680 = vmatprep.subr.bf16.mxu1 %v1679_v55  ;;  %1666 = vmatpush1.bf16.msra.mxu0 %v1665_v51 }
 0x159   : > { %1682 = vmatpush1.bf16.msra.mxu1 %v1681_v53 }
 0x15b   : > { %1441 = vmatmul.mubr.msk.f32.vlgmr.msra.gmra.mrb[16].mxu0 %vm925_vm2, %v897_v56 }
 0x15c   : > { %1445 = vmatmul.mubr.msk.f32.vlgmr.msra.gmra.mrb[16].mxu1 %vm925_vm2, %v897_v56  ;;  %1008 = vmatprep.mubr.f32.mxu0 %v1808_v60 }
 0x15d   : > { %1097 = vmatprep.mubr.f32.mxu1 %v1808_v60 }
 0x15f   : > { %1442 = vmatmul.mubr.msk.f32.gmra.mrb[18].mxu0 %vm925_vm2, %v898_v1 }
 0x160   : > { %1446 = vmatmul.mubr.msk.f32.gmra.mrb[18].mxu1 %vm925_vm2, %v898_v1  ;;  %1014 = vmatprep.mubr.f32.mxu0 %v1808_v60 }
 0x161   : > { %1103 = vmatprep.mubr.f32.mxu1 %v1808_v60 }
 0x163   : > { %1443 = vmatmul.mubr.msk.f32.gmra.mrb[20].mxu0 %vm925_vm2, %v899_v6 }
 0x164   : > { %1447 = vmatmul.mubr.msk.f32.gmra.mrb[20].mxu1 %vm925_vm2, %v899_v6  ;;  %1020 = vmatprep.mubr.f32.mxu0 %v1808_v60 }
 0x165   : > { %1109 = vmatprep.mubr.f32.mxu1 %v1808_v60 }
 0x167   : > { %1444 = vmatmul.mubr.msk.f32.gmra.mrb[22].mxu0 %vm925_vm2, %v900_v57 }
 0x168   : > { %1448 = vmatmul.mubr.msk.f32.gmra.mrb[22].mxu1 %vm925_vm2, %v900_v57 }
 0x22e   : > { %v1004_v62 = vpop.f32.mrb[16].mxu0 }
 0x22f   : > { %v1005_v63 = vadd.f32 %v1004_v62, %v908_v58  ;;  %v1093_v0 = vpop.f32.mrb[16].mxu1  ;;  %v1006_v2 = vpop.f32.mrb[17].mxu0 }
 0x230   : > { %v1094_v4 = vadd.f32 %v1093_v0, %v908_v58  ;;  %v1007_v5 = vadd.f32 %v1006_v2, %v908_v58  ;;  %v1095_v7 = vpop.f32.mrb[17].mxu1  ;;  %v1154_v0 = vpop.permute.xlu1 %1153 }
 0x231   : > { %v1116_v8 = vmax.f32 %v1005_v63, 0.0  ;;  %v1096_v9 = vadd.f32 %v1095_v7, %v908_v58 }
 0x232   : > { %v1118_v10 = vmax.f32 %v1094_v4, 0.0  ;;  %v1117_v11 = vmax.f32 %v1007_v5, 0.0  ;;  %v1010_v60 = vpop.f32.mrb[18].mxu0 }
 0x233   : > { %v1119_v12 = vmax.f32 %v1096_v9, 0.0  ;;  %v1011_v13 = vadd.f32 %v1010_v60, %v913_v59  ;;  %v1099_v14 = vpop.f32.mrb[18].mxu1  ;;  %v1012_v15 = vpop.f32.mrb[19].mxu0  ;;  %v1156_v20 = vmul.f32 %v1139_v16, %v1116_v8 }
 0x234   : > { %v1100_v17 = vadd.f32 %v1099_v14, %v913_v59  ;;  %v1013_v18 = vadd.f32 %v1012_v15, %v913_v59  ;;  %v1101_v19 = vpop.f32.mrb[19].mxu1  ;;  %v1158_v24 = vmul.f32 %v1139_v16, %v1118_v10  ;;  %v1157_v25 = vmul.f32 %v1139_v16, %v1117_v11 }
 0x235   : > { %v1120_v21 = vmax.f32 %v1011_v13, 0.0  ;;  %v1102_v22 = vadd.f32 %v1101_v19, %v913_v59  ;;  %v1159_v29 = vmul.f32 %v1139_v16, %v1119_v12  ;;  %v1214_v12 = vlaneseq }
 0x236   : > { %v1122_v26 = vmax.f32 %v1100_v17, 0.0  ;;  %v1121_v27 = vmax.f32 %v1013_v18, 0.0  ;;  %v1016_v28 = vpop.f32.mrb[20].mxu0 }
 0x237   : > { %v1160_v30 = vmul.f32 %v1144_v23, %v1120_v21  ;;  %v1123_v31 = vmax.f32 %v1102_v22, 0.0  ;;  %v1017_v32 = vadd.f32 %v1016_v28, %v918_v61  ;;  %v1105_v33 = vpop.f32.mrb[20].mxu1  ;;  %v1018_v34 = vpop.f32.mrb[21].mxu0  ;;  %vm1277_vm3 = vcmp.lt.s32.totalorder %v1214_v12, 512 }
 0x238   : > { %v1162_v35 = vmul.f32 %v1144_v23, %v1122_v26  ;;  %v1161_v36 = vmul.f32 %v1144_v23, %v1121_v27  ;;  %v1106_v37 = vadd.f32 %v1105_v33, %v918_v61  ;;  %v1019_v38 = vadd.f32 %v1018_v34, %v918_v61  ;;  %v1107_v39 = vpop.f32.mrb[21].mxu1 }
 0x239   : > { %v1172_v40 = vadd.f32 %v1160_v30, %v1156_v20  ;;  %v1163_v41 = vmul.f32 %v1144_v23, %v1123_v31  ;;  %v1124_v42 = vmax.f32 %v1017_v32, 0.0  ;;  %v1108_v43 = vadd.f32 %v1107_v39, %v918_v61  ;;  %v1212_v32 = vpop.permute.xlu0 %1211 }
 0x23a   : > { %v1190_v45 = vadd.f32 %v1162_v35, %v1158_v24  ;;  %v1181_v46 = vadd.f32 %v1161_v36, %v1157_v25  ;;  %v1126_v47 = vmax.f32 %v1106_v37, 0.0  ;;  %v1125_v48 = vmax.f32 %v1019_v38, 0.0  ;;  %v1022_v49 = vpop.f32.mrb[22].mxu0 }
 0x23b   : > { %v1199_v50 = vadd.f32 %v1163_v41, %v1159_v29  ;;  %v1164_v51 = vmul.f32 %v1149_v44, %v1124_v42  ;;  %v1127_v52 = vmax.f32 %v1108_v43, 0.0  ;;  %v1023_v53 = vadd.f32 %v1022_v49, %v923_v3  ;;  %v1111_v54 = vpop.f32.mrb[22].mxu1  ;;  %v1024_v55 = vpop.f32.mrb[23].mxu0 }
 0x23c   : > { %v1166_v56 = vmul.f32 %v1149_v44, %v1126_v47  ;;  %v1165_v1 = vmul.f32 %v1149_v44, %v1125_v48  ;;  %v1112_v6 = vadd.f32 %v1111_v54, %v923_v3  ;;  %v1025_v57 = vadd.f32 %v1024_v55, %v923_v3  ;;  %v1113_v58 = vpop.f32.mrb[23].mxu1 }
 0x23d   : > { %v1173_v59 = vadd.f32 %v1172_v40, %v1164_v51  ;;  %v1167_v62 = vmul.f32 %v1149_v44, %v1127_v52  ;;  %v1128_v61 = vmax.f32 %v1023_v53, 0.0  ;;  %v1114_v63 = vadd.f32 %v1113_v58, %v923_v3 }
 0x23e   : > { %v1191_v2 = vadd.f32 %v1190_v45, %v1166_v56  ;;  %v1182_v4 = vadd.f32 %v1181_v46, %v1165_v1  ;;  %v1130_v5 = vmax.f32 %v1112_v6, 0.0  ;;  %v1129_v7 = vmax.f32 %v1025_v57, 0.0 }
 0x23f   : > { %v1200_v8 = vadd.f32 %v1199_v50, %v1167_v62  ;;  %v1168_v9 = vmul.f32 %v1154_v0, %v1128_v61  ;;  %v1131_v10 = vmax.f32 %v1114_v63, 0.0  ;;  %v1215_v3 = vshrl.u32 %v1214_v12, 7 }
 0x240   : > { %v1170_v11 = vmul.f32 %v1154_v0, %v1130_v5  ;;  %v1169_v60 = vmul.f32 %v1154_v0, %v1129_v7 }
 0x241   : > { %v1174_v13 = vadd.f32 %v1173_v59, %v1168_v9  ;;  %v1171_v14 = vmul.f32 %v1154_v0, %v1131_v10  ;;  %v1216_v29 = vsub.s32 0, %v1215_v3  ;;  %v1809_v59 = vmov 1966171168  }
 0x242   : > { %v1192_v15 = vadd.f32 %v1191_v2, %v1170_v11  ;;  %v1183_v16 = vadd.f32 %v1182_v4, %v1169_v60  ;;  %v1253_v62 = vunpack.c.l.s4 %v1809_v59 }
 0x243   : > { %v1175_v17 = vrot.slane %v1174_v13, 4  ;;  %v1201_v18 = vadd.f32 %v1200_v8, %v1171_v14  ;;  %v1217_v39 = vrot.slane %v1212_v32, %v1216_v29 }
 0x244   : > { %v1193_v19 = vrot.slane %v1192_v15, 4  ;;  %v1184_v20 = vrot.slane %v1183_v16, 4  ;;  %v1254_v61 = vunpack.c.0.s8 %v1253_v62 }
 0x245   : > { %v1176_v21 = vadd.f32 %v1175_v17, %v1174_v13  ;;  %v1202_v22 = vrot.slane %v1201_v18, 4 }
 0x246   : > { %v1194_v23 = vadd.f32 %v1193_v19, %v1192_v15  ;;  %v1185_v24 = vadd.f32 %v1184_v20, %v1183_v16  ;;  %v1257_v2 = vsub.s32 %v1254_v61, %v1215_v3 }
 0x247   : > { %v1177_v25 = vrot.slane %v1176_v21, 2  ;;  %v1203_v26 = vadd.f32 %v1202_v22, %v1201_v18 }
 0x248   : > { %v1195_v27 = vrot.slane %v1194_v23, 2  ;;  %v1186_v28 = vrot.slane %v1185_v24, 2 }
 0x249   : > { %v1178_v30 = vadd.f32 %v1177_v25, %v1176_v21  ;;  %v1204_v31 = vrot.slane %v1203_v26, 2 }
 0x24a   : > { %v1196_v33 = vadd.f32 %v1195_v27, %v1194_v23  ;;  %v1187_v34 = vadd.f32 %v1186_v28, %v1185_v24 }
 0x24b   : > { %v1179_v35 = vrot.slane %v1178_v30, 1  ;;  %v1205_v36 = vadd.f32 %v1204_v31, %v1203_v26 }
 0x24c   : > { %v1197_v37 = vrot.slane %v1196_v33, 1  ;;  %v1188_v38 = vrot.slane %v1187_v34, 1 }
 0x24d   : > { %v1180_v40 = vadd.f32 %v1179_v35, %v1178_v30  ;;  %v1206_v41 = vrot.slane %v1205_v36, 1 }
 0x24e   : > { %v1198_v42 = vadd.f32 %v1197_v37, %v1196_v33  ;;  %v1189_v43 = vadd.f32 %v1188_v38, %v1187_v34 }
 0x24f   : > { %v1218_v44 = vadd.f32 %v1217_v39, %v1180_v40  ;;  %v1207_v45 = vadd.f32 %v1206_v41, %v1205_v36 }
 0x250   : > { %v1220_v46 = vadd.f32 %v1217_v39, %v1198_v42  ;;  %v1219_v47 = vadd.f32 %v1217_v39, %v1189_v43 }
 0x251   : > { %v1449_v48 = vmul.f32 -1.442695, %v1218_v44  ;;  %v1221_v49 = vadd.f32 %v1217_v39, %v1207_v45 }
 0x252   : > { %v1451_v50 = vmul.f32 -1.442695, %v1220_v46  ;;  %v1450_v51 = vmul.f32 -1.442695, %v1219_v47 }
 0x253   : > { %1727 = vpow2.f32 %v1449_v48  ;;  %v1452_v52 = vmul.f32 -1.442695, %v1221_v49 }
 0x254   : > { %1729 = vpow2.f32 %v1451_v50 }
 0x255   : > { %1731 = vpow2.f32 %v1450_v51 }
 0x256   : > { %1733 = vpow2.f32 %v1452_v52 }
 0x25d   : > { %v1728_v53 = vpop.eup %1727 }
 0x25e   : > { %v1730_v54 = vpop.eup %1729  ;;  %v1234_v55 = vadd.f32 1.0, %v1728_v53 }
 0x25f   : > { %v1732_v56 = vpop.eup %1731  ;;  %v1236_v1 = vadd.f32 1.0, %v1730_v54 }
 0x260   : > { %v1734_v6 = vpop.eup %1733  ;;  %1735 = vrcp.f32 %v1234_v55  ;;  %v1235_v57 = vadd.f32 1.0, %v1732_v56 }
 0x261   : > { %1737 = vrcp.f32 %v1236_v1  ;;  %v1237_v58 = vadd.f32 1.0, %v1734_v6 }
 0x262   : > { %1739 = vrcp.f32 %v1235_v57 }
 0x263   : > { %1741 = vrcp.f32 %v1237_v58 }
 0x26a   : > { %v1736_v63 = vpop.eup %1735 }
 0x26b   : > { %v1738_v0 = vpop.eup %1737 }
 0x26c   : > { %v1740_v4 = vpop.eup %1739 }
 0x26d   : > { %v1742_v5 = vpop.eup %1741  ;;  %v1250_v7 = vcombine.low %v1736_v63, %v1740_v4 }
 0x26e   : > { %v1251_v8 = vcombine.low %v1738_v0, %v1742_v5 }
 0x26f   : > { %v1258_v9 = vrot.slane %v1250_v7, %v1257_v2 }
 0x270   : > { %v1265_v10 = vrot.slane %v1251_v8, %v1257_v2 }
 0x272   : > { %v1266_v11 = vcombine.low %v1258_v9, %v1265_v10 }
 0x274   : > { %v1273_v60 = vrot.slane %v1266_v11, %v1257_v2 }
 0x276   : > { %1279 = vst.msk [vmem:[%s286_s19] sm:$0xf] %vm1277_vm3, %v1273_v60 }
 0x277   : > { %1756 = shalt.err (!%p1753_p3)
}
 0x278   : > { %s1757_s14 = scalar_lea.hbm %s2187_s23, 64  ;;  %s1761_s16 = scalar_lea.hbm %s2236_s7, 128 }
 0x279   : > { %p1758_p4 = scmp.ne.s32.totalorder %s2187_s23, %s1757_s14  ;;  %p1762_p9 = scmp.lt.u32.totalorder %s2187_s23, %s2236_s7 }
 0x27a   : > { %p1763_p10 = scmp.lt.u32.totalorder %s1761_s16, %s1757_s14  ;;  %p1765_p12 = scmp.lt.u32.totalorder %s1757_s14, %s2187_s23 }
 0x27b   : > { %p1759_p7 = pnand %p1758_p4, %p1889_p5 }
 0x27c   : > { %p1764_p11 = por %p1763_p10, %p1762_p9 }
 0x27d   : > { %p1760_p8 = pneg %p1759_p7 }
 0x27e   : > { %p1766_p13 = por %p1765_p12, %p1764_p11 }
 0x280   : > { %p1767_p0 = pnand %p1766_p13, %p1760_p8 }
 0x282   : > { %1770 = shalt.err (!%p1767_p0)
}
 0x283   : > { %1683 = dma.vmem_to_hbm [thread:$0]  (%p1889_p5), %s2189_s20, 64, %s2187_s23, %s1281_s24  }
 0x284 PF: > { %p1689_p1 = scmp.ge.s32.totalorder %s1805_s29, 2  ;;  %s1307_s19 = sand.u32 1, %s1793_s26  }
 0x285   : > { %s1308_s21 = scalar_lea.sflag [#allocation4], %s1307_s19 }
 0x286   : > { %p1686_p2 = pnand %p1689_p1, %p1893_p6 }
 0x288   : > { %1788 = dma.done.wait (!%p1686_p2), %s1308_s21, 64  }
 0x289   : > { %1790 = vsyncadd (!%p1686_p2), %s1308_s21, 4294967232  ;;  %p19_p3 = scmp.ge.s32.totalorder %s1877_s8, 4   ;;  %s2241_s26 = smov %s1797_s27 }
 0x28a   : > { %s2242_s27 = smov %s1801_s28  ;;  %s2243_s28 = smov %s1887_s11 }
 0x28b   : > { %s2244_s29 = smov %s1877_s8  ;;  %21 = sbr.rel (!%p19_p3) target bundleno = 6 (0x6), region = 83 }
 0x292   :  { %1313 = vsyncpa [#allocation4], 1 }
 0x293   :  { %1315 = vsyncpa [#allocation4 + $0x1], 1 }

</bundles_post_ra>
